<compile_context>
chip_gen: v7x
topology: tpu7x:2x2x1
jax: 0.10.0
libtpu: 0.0.40
codegen_flags: <defaults>
</compile_context>

<pallas_src>
import jax
import jax.numpy as jnp
from jax.experimental import pallas as pl
from jax.experimental.pallas import tpu as pltpu


def conv1x1_add_kernel(x_ref, t2_ref, w_ref, b_ref, o_ref):
    # x_ref : (1, Cin,  TH, Wp) VMEM    t2_ref: (1, Cout, TH, Wp) VMEM
    # w_ref : (Cout, Cin)       SMEM    b_ref : (Cout,)           SMEM
    # o_ref : (1, Cout, TH, Wp) VMEM
    cin = x_ref.shape[1]
    cout = o_ref.shape[1]
    # Hoist the three input-channel slabs: loaded once, reused for every cout.
    xs = [x_ref[0, ci] for ci in range(cin)]
    for co in range(cout):
        acc = t2_ref[0, co] + b_ref[co]               # residual + bias
        for ci in range(cin):                         # 1x1 conv: scalar FMAs
            acc = acc + w_ref[co, ci] * xs[ci]
        o_ref[0, co] = acc.astype(o_ref.dtype)


def _round_up(x, m):
    return -(-x // m) * m


def _pick_row_tile(n, hp, wp, cin, cout, *,
                   spatial_cap=32768, vmem_budget=12 * 1024 * 1024):
    """Rows per block (TH): multiple of 8 (or the full height), sized so each
    grid step moves a few MB, the double-buffered VMEM footprint stays under
    every chip's default scoped limit, and the grid has >= 2 programs whenever
    the shape allows (v7x megacore)."""
    wp_pad = _round_up(wp, 128)                         # lane padding in VMEM
    th_cap = max(8, spatial_cap // max(wp, 1))          # ~32K spatial elems/step
    bytes_per_row = (cin + 2 * cout) * wp_pad * 4 * 2   # x + t2 + out, x2 buffers
    th_vmem = max(8, vmem_budget // bytes_per_row)
    th = min(th_cap, th_vmem, hp)
    if th < hp:
        th = max(8, (th // 8) * 8)
    if th >= hp:
        th = hp                                         # full-extent block
    # Guarantee >= 2 total grid programs when possible (both TensorCores busy).
    if n * (-(-hp // th)) < 2 and hp > 8:
        th = max(8, ((hp - 1) // 8) * 8)
    return th


def model_forward(x1, t2, weight, bias):
    """out = conv2d(x1, 1x1 kernel, stride=1, padding=1) + bias + t2.
    x1: (N, Cin, H, W) f32; t2: (N, Cout, H+2, W+2) f32;
    weight: (Cout, Cin) f32 (squeezed 1x1 kernel); bias: (Cout,) f32.
    Returns (N, Cout, H+2, W+2) f32."""
    n, cin, h, w = x1.shape
    cout = weight.shape[0]
    hp, wp = h + 2, w + 2

    # padding=1 on a 1x1 conv only zero-pads the border; pad the small
    # 3-channel input once.  Everything stays NCHW 4-D (no relayout copies).
    xp = jnp.pad(x1, ((0, 0), (0, 0), (1, 1), (1, 1)))

    th = _pick_row_tile(n, hp, wp, cin, cout)
    grid = (n, pl.cdiv(hp, th))

    return pl.pallas_call(
        conv1x1_add_kernel,
        out_shape=jax.ShapeDtypeStruct((n, cout, hp, wp), jnp.float32),
        grid_spec=pltpu.PrefetchScalarGridSpec(
            num_scalar_prefetch=0,
            grid=grid,
            in_specs=[
                pl.BlockSpec((1, cin, th, wp), lambda b, i: (b, 0, i, 0)),
                pl.BlockSpec((1, cout, th, wp), lambda b, i: (b, 0, i, 0)),
                pl.BlockSpec(memory_space=pltpu.MemorySpace.SMEM),   # weight
                pl.BlockSpec(memory_space=pltpu.MemorySpace.SMEM),   # bias
            ],
            out_specs=pl.BlockSpec((1, cout, th, wp), lambda b, i: (b, 0, i, 0)),
        ),
        compiler_params=pltpu.CompilerParams(
            dimension_semantics=("parallel", "parallel")),
    )(xp, t2, weight, bias)


if __name__ == "__main__":
    key = jax.random.PRNGKey(0)
    k1, k2, k3, k4 = jax.random.split(key, 4)

    # Small shapes consistent with the module (3->8 channel 1x1 conv, padding=1).
    N, CIN, COUT, H, W = 2, 3, 8, 30, 30   # padded output: (2, 8, 32, 32)

    x1 = jax.random.normal(k1, (N, CIN, H, W), dtype=jnp.float32)
    t2 = jax.random.normal(k2, (N, COUT, H + 2, W + 2), dtype=jnp.float32)

    # Deterministic parameter init (Conv2d(3, 8, 1) -> weight (8,3,1,1), bias (8,))
    fan_in = CIN * 1 * 1
    bound = 1.0 / (fan_in ** 0.5)
    weight = jax.random.uniform(k3, (COUT, CIN), jnp.float32, -bound, bound)
    bias = jax.random.uniform(k4, (COUT,), jnp.float32, -bound, bound)

    out = jax.block_until_ready(model_forward(x1, t2, weight, bias))

    # Reference check (plain JAX): 1x1 conv w/ zero padding + bias + residual
    xp = jnp.pad(x1, ((0, 0), (0, 0), (1, 1), (1, 1)))
    ref = jnp.einsum("oc,nchw->nohw", weight, xp) + bias[None, :, None, None] + t2
    assert out.shape == (N, COUT, H + 2, W + 2)
    assert jnp.allclose(out, ref, atol=1e-5, rtol=1e-5)

    print("KERNEL_OK")
</pallas_src>

<mosaic_0001>
module attributes {stable_mosaic.version = 11 : i64} {
  func.func @conv1x1_add_kernel(%arg0: i32, %arg1: i32, %arg2: memref<1x3x32x32xf32, #tpu.memory_space<vmem>>, %arg3: memref<1x8x32x32xf32, #tpu.memory_space<vmem>>, %arg4: memref<8x3xf32, #tpu.memory_space<smem>>, %arg5: memref<8xf32, #tpu.memory_space<smem>>, %arg6: memref<1x8x32x32xf32, #tpu.memory_space<vmem>>) attributes {dimension_semantics = [#tpu.dimension_semantics<parallel>, #tpu.dimension_semantics<parallel>], iteration_bounds = array<i64: 2, 1>, scalar_prefetch = 0 : i64, scratch_operands = 0 : i64, tpu.core_type = #tpu.core_type<tc>, window_params = [{transform_indices = @transform_0, window_bounds = array<i64: 1, 3, 32, 32>}, {transform_indices = @transform_1, window_bounds = array<i64: 1, 8, 32, 32>}, {transform_indices = @transform_2, window_bounds = array<i64: 8, 3>}, {transform_indices = @transform_3, window_bounds = array<i64: 8>}, {transform_indices = @transform_4, window_bounds = array<i64: 1, 8, 32, 32>}]} {
    %c0 = arith.constant 0 : index
    %c0_0 = arith.constant 0 : index
    %c0_1 = arith.constant 0 : index
    %c0_2 = arith.constant 0 : index
    %0 = vector.load %arg2[%c0, %c0_0, %c0_1, %c0_2] : memref<1x3x32x32xf32, #tpu.memory_space<vmem>>, vector<1x1x32x32xf32>
    %1 = vector.shape_cast %0 : vector<1x1x32x32xf32> to vector<32x32xf32>
    %c0_3 = arith.constant 0 : index
    %c1 = arith.constant 1 : index
    %c0_4 = arith.constant 0 : index
    %c0_5 = arith.constant 0 : index
    %2 = vector.load %arg2[%c0_3, %c1, %c0_4, %c0_5] : memref<1x3x32x32xf32, #tpu.memory_space<vmem>>, vector<1x1x32x32xf32>
    %3 = vector.shape_cast %2 : vector<1x1x32x32xf32> to vector<32x32xf32>
    %c0_6 = arith.constant 0 : index
    %c2 = arith.constant 2 : index
    %c0_7 = arith.constant 0 : index
    %c0_8 = arith.constant 0 : index
    %4 = vector.load %arg2[%c0_6, %c2, %c0_7, %c0_8] : memref<1x3x32x32xf32, #tpu.memory_space<vmem>>, vector<1x1x32x32xf32>
    %5 = vector.shape_cast %4 : vector<1x1x32x32xf32> to vector<32x32xf32>
    %c0_9 = arith.constant 0 : index
    %c0_10 = arith.constant 0 : index
    %c0_11 = arith.constant 0 : index
    %c0_12 = arith.constant 0 : index
    %6 = vector.load %arg3[%c0_9, %c0_10, %c0_11, %c0_12] : memref<1x8x32x32xf32, #tpu.memory_space<vmem>>, vector<1x1x32x32xf32>
    %7 = vector.shape_cast %6 : vector<1x1x32x32xf32> to vector<32x32xf32>
    %c0_13 = arith.constant 0 : index
    %8 = memref.load %arg5[%c0_13] : memref<8xf32, #tpu.memory_space<smem>>
    %9 = vector.broadcast %8 : f32 to vector<32x32xf32>
    %10 = arith.addf %7, %9 : vector<32x32xf32>
    %c0_14 = arith.constant 0 : index
    %c0_15 = arith.constant 0 : index
    %11 = memref.load %arg4[%c0_14, %c0_15] : memref<8x3xf32, #tpu.memory_space<smem>>
    %12 = vector.broadcast %11 : f32 to vector<32x32xf32>
    %13 = arith.mulf %12, %1 : vector<32x32xf32>
    %14 = arith.addf %10, %13 : vector<32x32xf32>
    %c0_16 = arith.constant 0 : index
    %c1_17 = arith.constant 1 : index
    %15 = memref.load %arg4[%c0_16, %c1_17] : memref<8x3xf32, #tpu.memory_space<smem>>
    %16 = vector.broadcast %15 : f32 to vector<32x32xf32>
    %17 = arith.mulf %16, %3 : vector<32x32xf32>
    %18 = arith.addf %14, %17 : vector<32x32xf32>
    %c0_18 = arith.constant 0 : index
    %c2_19 = arith.constant 2 : index
    %19 = memref.load %arg4[%c0_18, %c2_19] : memref<8x3xf32, #tpu.memory_space<smem>>
    %20 = vector.broadcast %19 : f32 to vector<32x32xf32>
    %21 = arith.mulf %20, %5 : vector<32x32xf32>
    %22 = arith.addf %18, %21 : vector<32x32xf32>
    %c0_20 = arith.constant 0 : index
    %c0_21 = arith.constant 0 : index
    %c0_22 = arith.constant 0 : index
    %c0_23 = arith.constant 0 : index
    %23 = vector.load %arg6[%c0_20, %c0_21, %c0_22, %c0_23] : memref<1x8x32x32xf32, #tpu.memory_space<vmem>>, vector<1x1x32x32xf32>
    %24 = vector.shape_cast %23 : vector<1x1x32x32xf32> to vector<32x32xf32>
    %25 = vector.shape_cast %22 : vector<32x32xf32> to vector<1x1x32x32xf32>
    tpu.vector_store %arg6[%c0_20, %c0_21, %c0_22, %c0_23], %25 {strides = array<i32>} : memref<1x8x32x32xf32, #tpu.memory_space<vmem>>, vector<1x1x32x32xf32>,
    %c0_24 = arith.constant 0 : index
    %c1_25 = arith.constant 1 : index
    %c0_26 = arith.constant 0 : index
    %c0_27 = arith.constant 0 : index
    %26 = vector.load %arg3[%c0_24, %c1_25, %c0_26, %c0_27] : memref<1x8x32x32xf32, #tpu.memory_space<vmem>>, vector<1x1x32x32xf32>
    %27 = vector.shape_cast %26 : vector<1x1x32x32xf32> to vector<32x32xf32>
    %c1_28 = arith.constant 1 : index
    %28 = memref.load %arg5[%c1_28] : memref<8xf32, #tpu.memory_space<smem>>
    %29 = vector.broadcast %28 : f32 to vector<32x32xf32>
    %30 = arith.addf %27, %29 : vector<32x32xf32>
    %c1_29 = arith.constant 1 : index
    %c0_30 = arith.constant 0 : index
    %31 = memref.load %arg4[%c1_29, %c0_30] : memref<8x3xf32, #tpu.memory_space<smem>>
    %32 = vector.broadcast %31 : f32 to vector<32x32xf32>
    %33 = arith.mulf %32, %1 : vector<32x32xf32>
    %34 = arith.addf %30, %33 : vector<32x32xf32>
    %c1_31 = arith.constant 1 : index
    %c1_32 = arith.constant 1 : index
    %35 = memref.load %arg4[%c1_31, %c1_32] : memref<8x3xf32, #tpu.memory_space<smem>>
    %36 = vector.broadcast %35 : f32 to vector<32x32xf32>
    %37 = arith.mulf %36, %3 : vector<32x32xf32>
    %38 = arith.addf %34, %37 : vector<32x32xf32>
    %c1_33 = arith.constant 1 : index
    %c2_34 = arith.constant 2 : index
    %39 = memref.load %arg4[%c1_33, %c2_34] : memref<8x3xf32, #tpu.memory_space<smem>>
    %40 = vector.broadcast %39 : f32 to vector<32x32xf32>
    %41 = arith.mulf %40, %5 : vector<32x32xf32>
    %42 = arith.addf %38, %41 : vector<32x32xf32>
    %c0_35 = arith.constant 0 : index
    %c1_36 = arith.constant 1 : index
    %c0_37 = arith.constant 0 : index
    %c0_38 = arith.constant 0 : index
    %43 = vector.load %arg6[%c0_35, %c1_36, %c0_37, %c0_38] : memref<1x8x32x32xf32, #tpu.memory_space<vmem>>, vector<1x1x32x32xf32>
    %44 = vector.shape_cast %43 : vector<1x1x32x32xf32> to vector<32x32xf32>
    %45 = vector.shape_cast %42 : vector<32x32xf32> to vector<1x1x32x32xf32>
    tpu.vector_store %arg6[%c0_35, %c1_36, %c0_37, %c0_38], %45 {strides = array<i32>} : memref<1x8x32x32xf32, #tpu.memory_space<vmem>>, vector<1x1x32x32xf32>,
    %c0_39 = arith.constant 0 : index
    %c2_40 = arith.constant 2 : index
    %c0_41 = arith.constant 0 : index
    %c0_42 = arith.constant 0 : index
    %46 = vector.load %arg3[%c0_39, %c2_40, %c0_41, %c0_42] : memref<1x8x32x32xf32, #tpu.memory_space<vmem>>, vector<1x1x32x32xf32>
    %47 = vector.shape_cast %46 : vector<1x1x32x32xf32> to vector<32x32xf32>
    %c2_43 = arith.constant 2 : index
    %48 = memref.load %arg5[%c2_43] : memref<8xf32, #tpu.memory_space<smem>>
    %49 = vector.broadcast %48 : f32 to vector<32x32xf32>
    %50 = arith.addf %47, %49 : vector<32x32xf32>
    %c2_44 = arith.constant 2 : index
    %c0_45 = arith.constant 0 : index
    %51 = memref.load %arg4[%c2_44, %c0_45] : memref<8x3xf32, #tpu.memory_space<smem>>
    %52 = vector.broadcast %51 : f32 to vector<32x32xf32>
    %53 = arith.mulf %52, %1 : vector<32x32xf32>
    %54 = arith.addf %50, %53 : vector<32x32xf32>
    %c2_46 = arith.constant 2 : index
    %c1_47 = arith.constant 1 : index
    %55 = memref.load %arg4[%c2_46, %c1_47] : memref<8x3xf32, #tpu.memory_space<smem>>
    %56 = vector.broadcast %55 : f32 to vector<32x32xf32>
    %57 = arith.mulf %56, %3 : vector<32x32xf32>
    %58 = arith.addf %54, %57 : vector<32x32xf32>
    %c2_48 = arith.constant 2 : index
    %c2_49 = arith.constant 2 : index
    %59 = memref.load %arg4[%c2_48, %c2_49] : memref<8x3xf32, #tpu.memory_space<smem>>
    %60 = vector.broadcast %59 : f32 to vector<32x32xf32>
    %61 = arith.mulf %60, %5 : vector<32x32xf32>
    %62 = arith.addf %58, %61 : vector<32x32xf32>
    %c0_50 = arith.constant 0 : index
    %c2_51 = arith.constant 2 : index
    %c0_52 = arith.constant 0 : index
    %c0_53 = arith.constant 0 : index
    %63 = vector.load %arg6[%c0_50, %c2_51, %c0_52, %c0_53] : memref<1x8x32x32xf32, #tpu.memory_space<vmem>>, vector<1x1x32x32xf32>
    %64 = vector.shape_cast %63 : vector<1x1x32x32xf32> to vector<32x32xf32>
    %65 = vector.shape_cast %62 : vector<32x32xf32> to vector<1x1x32x32xf32>
    tpu.vector_store %arg6[%c0_50, %c2_51, %c0_52, %c0_53], %65 {strides = array<i32>} : memref<1x8x32x32xf32, #tpu.memory_space<vmem>>, vector<1x1x32x32xf32>,
    %c0_54 = arith.constant 0 : index
    %c3 = arith.constant 3 : index
    %c0_55 = arith.constant 0 : index
    %c0_56 = arith.constant 0 : index
    %66 = vector.load %arg3[%c0_54, %c3, %c0_55, %c0_56] : memref<1x8x32x32xf32, #tpu.memory_space<vmem>>, vector<1x1x32x32xf32>
    %67 = vector.shape_cast %66 : vector<1x1x32x32xf32> to vector<32x32xf32>
    %c3_57 = arith.constant 3 : index
    %68 = memref.load %arg5[%c3_57] : memref<8xf32, #tpu.memory_space<smem>>
    %69 = vector.broadcast %68 : f32 to vector<32x32xf32>
    %70 = arith.addf %67, %69 : vector<32x32xf32>
    %c3_58 = arith.constant 3 : index
    %c0_59 = arith.constant 0 : index
    %71 = memref.load %arg4[%c3_58, %c0_59] : memref<8x3xf32, #tpu.memory_space<smem>>
    %72 = vector.broadcast %71 : f32 to vector<32x32xf32>
    %73 = arith.mulf %72, %1 : vector<32x32xf32>
    %74 = arith.addf %70, %73 : vector<32x32xf32>
    %c3_60 = arith.constant 3 : index
    %c1_61 = arith.constant 1 : index
    %75 = memref.load %arg4[%c3_60, %c1_61] : memref<8x3xf32, #tpu.memory_space<smem>>
    %76 = vector.broadcast %75 : f32 to vector<32x32xf32>
    %77 = arith.mulf %76, %3 : vector<32x32xf32>
    %78 = arith.addf %74, %77 : vector<32x32xf32>
    %c3_62 = arith.constant 3 : index
    %c2_63 = arith.constant 2 : index
    %79 = memref.load %arg4[%c3_62, %c2_63] : memref<8x3xf32, #tpu.memory_space<smem>>
    %80 = vector.broadcast %79 : f32 to vector<32x32xf32>
    %81 = arith.mulf %80, %5 : vector<32x32xf32>
    %82 = arith.addf %78, %81 : vector<32x32xf32>
    %c0_64 = arith.constant 0 : index
    %c3_65 = arith.constant 3 : index
    %c0_66 = arith.constant 0 : index
    %c0_67 = arith.constant 0 : index
    %83 = vector.load %arg6[%c0_64, %c3_65, %c0_66, %c0_67] : memref<1x8x32x32xf32, #tpu.memory_space<vmem>>, vector<1x1x32x32xf32>
    %84 = vector.shape_cast %83 : vector<1x1x32x32xf32> to vector<32x32xf32>
    %85 = vector.shape_cast %82 : vector<32x32xf32> to vector<1x1x32x32xf32>
    tpu.vector_store %arg6[%c0_64, %c3_65, %c0_66, %c0_67], %85 {strides = array<i32>} : memref<1x8x32x32xf32, #tpu.memory_space<vmem>>, vector<1x1x32x32xf32>,
    %c0_68 = arith.constant 0 : index
    %c4 = arith.constant 4 : index
    %c0_69 = arith.constant 0 : index
    %c0_70 = arith.constant 0 : index
    %86 = vector.load %arg3[%c0_68, %c4, %c0_69, %c0_70] : memref<1x8x32x32xf32, #tpu.memory_space<vmem>>, vector<1x1x32x32xf32>
    %87 = vector.shape_cast %86 : vector<1x1x32x32xf32> to vector<32x32xf32>
    %c4_71 = arith.constant 4 : index
    %88 = memref.load %arg5[%c4_71] : memref<8xf32, #tpu.memory_space<smem>>
    %89 = vector.broadcast %88 : f32 to vector<32x32xf32>
    %90 = arith.addf %87, %89 : vector<32x32xf32>
    %c4_72 = arith.constant 4 : index
    %c0_73 = arith.constant 0 : index
    %91 = memref.load %arg4[%c4_72, %c0_73] : memref<8x3xf32, #tpu.memory_space<smem>>
    %92 = vector.broadcast %91 : f32 to vector<32x32xf32>
    %93 = arith.mulf %92, %1 : vector<32x32xf32>
    %94 = arith.addf %90, %93 : vector<32x32xf32>
    %c4_74 = arith.constant 4 : index
    %c1_75 = arith.constant 1 : index
    %95 = memref.load %arg4[%c4_74, %c1_75] : memref<8x3xf32, #tpu.memory_space<smem>>
    %96 = vector.broadcast %95 : f32 to vector<32x32xf32>
    %97 = arith.mulf %96, %3 : vector<32x32xf32>
    %98 = arith.addf %94, %97 : vector<32x32xf32>
    %c4_76 = arith.constant 4 : index
    %c2_77 = arith.constant 2 : index
    %99 = memref.load %arg4[%c4_76, %c2_77] : memref<8x3xf32, #tpu.memory_space<smem>>
    %100 = vector.broadcast %99 : f32 to vector<32x32xf32>
    %101 = arith.mulf %100, %5 : vector<32x32xf32>
    %102 = arith.addf %98, %101 : vector<32x32xf32>
    %c0_78 = arith.constant 0 : index
    %c4_79 = arith.constant 4 : index
    %c0_80 = arith.constant 0 : index
    %c0_81 = arith.constant 0 : index
    %103 = vector.load %arg6[%c0_78, %c4_79, %c0_80, %c0_81] : memref<1x8x32x32xf32, #tpu.memory_space<vmem>>, vector<1x1x32x32xf32>
    %104 = vector.shape_cast %103 : vector<1x1x32x32xf32> to vector<32x32xf32>
    %105 = vector.shape_cast %102 : vector<32x32xf32> to vector<1x1x32x32xf32>
    tpu.vector_store %arg6[%c0_78, %c4_79, %c0_80, %c0_81], %105 {strides = array<i32>} : memref<1x8x32x32xf32, #tpu.memory_space<vmem>>, vector<1x1x32x32xf32>,
    %c0_82 = arith.constant 0 : index
    %c5 = arith.constant 5 : index
    %c0_83 = arith.constant 0 : index
    %c0_84 = arith.constant 0 : index
    %106 = vector.load %arg3[%c0_82, %c5, %c0_83, %c0_84] : memref<1x8x32x32xf32, #tpu.memory_space<vmem>>, vector<1x1x32x32xf32>
    %107 = vector.shape_cast %106 : vector<1x1x32x32xf32> to vector<32x32xf32>
    %c5_85 = arith.constant 5 : index
    %108 = memref.load %arg5[%c5_85] : memref<8xf32, #tpu.memory_space<smem>>
    %109 = vector.broadcast %108 : f32 to vector<32x32xf32>
    %110 = arith.addf %107, %109 : vector<32x32xf32>
    %c5_86 = arith.constant 5 : index
    %c0_87 = arith.constant 0 : index
    %111 = memref.load %arg4[%c5_86, %c0_87] : memref<8x3xf32, #tpu.memory_space<smem>>
    %112 = vector.broadcast %111 : f32 to vector<32x32xf32>
    %113 = arith.mulf %112, %1 : vector<32x32xf32>
    %114 = arith.addf %110, %113 : vector<32x32xf32>
    %c5_88 = arith.constant 5 : index
    %c1_89 = arith.constant 1 : index
    %115 = memref.load %arg4[%c5_88, %c1_89] : memref<8x3xf32, #tpu.memory_space<smem>>
    %116 = vector.broadcast %115 : f32 to vector<32x32xf32>
    %117 = arith.mulf %116, %3 : vector<32x32xf32>
    %118 = arith.addf %114, %117 : vector<32x32xf32>
    %c5_90 = arith.constant 5 : index
    %c2_91 = arith.constant 2 : index
    %119 = memref.load %arg4[%c5_90, %c2_91] : memref<8x3xf32, #tpu.memory_space<smem>>
    %120 = vector.broadcast %119 : f32 to vector<32x32xf32>
    %121 = arith.mulf %120, %5 : vector<32x32xf32>
    %122 = arith.addf %118, %121 : vector<32x32xf32>
    %c0_92 = arith.constant 0 : index
    %c5_93 = arith.constant 5 : index
    %c0_94 = arith.constant 0 : index
    %c0_95 = arith.constant 0 : index
    %123 = vector.load %arg6[%c0_92, %c5_93, %c0_94, %c0_95] : memref<1x8x32x32xf32, #tpu.memory_space<vmem>>, vector<1x1x32x32xf32>
    %124 = vector.shape_cast %123 : vector<1x1x32x32xf32> to vector<32x32xf32>
    %125 = vector.shape_cast %122 : vector<32x32xf32> to vector<1x1x32x32xf32>
    tpu.vector_store %arg6[%c0_92, %c5_93, %c0_94, %c0_95], %125 {strides = array<i32>} : memref<1x8x32x32xf32, #tpu.memory_space<vmem>>, vector<1x1x32x32xf32>,
    %c0_96 = arith.constant 0 : index
    %c6 = arith.constant 6 : index
    %c0_97 = arith.constant 0 : index
    %c0_98 = arith.constant 0 : index
    %126 = vector.load %arg3[%c0_96, %c6, %c0_97, %c0_98] : memref<1x8x32x32xf32, #tpu.memory_space<vmem>>, vector<1x1x32x32xf32>
    %127 = vector.shape_cast %126 : vector<1x1x32x32xf32> to vector<32x32xf32>
    %c6_99 = arith.constant 6 : index
    %128 = memref.load %arg5[%c6_99] : memref<8xf32, #tpu.memory_space<smem>>
    %129 = vector.broadcast %128 : f32 to vector<32x32xf32>
    %130 = arith.addf %127, %129 : vector<32x32xf32>
    %c6_100 = arith.constant 6 : index
    %c0_101 = arith.constant 0 : index
    %131 = memref.load %arg4[%c6_100, %c0_101] : memref<8x3xf32, #tpu.memory_space<smem>>
    %132 = vector.broadcast %131 : f32 to vector<32x32xf32>
    %133 = arith.mulf %132, %1 : vector<32x32xf32>
    %134 = arith.addf %130, %133 : vector<32x32xf32>
    %c6_102 = arith.constant 6 : index
    %c1_103 = arith.constant 1 : index
    %135 = memref.load %arg4[%c6_102, %c1_103] : memref<8x3xf32, #tpu.memory_space<smem>>
    %136 = vector.broadcast %135 : f32 to vector<32x32xf32>
    %137 = arith.mulf %136, %3 : vector<32x32xf32>
    %138 = arith.addf %134, %137 : vector<32x32xf32>
    %c6_104 = arith.constant 6 : index
    %c2_105 = arith.constant 2 : index
    %139 = memref.load %arg4[%c6_104, %c2_105] : memref<8x3xf32, #tpu.memory_space<smem>>
    %140 = vector.broadcast %139 : f32 to vector<32x32xf32>
    %141 = arith.mulf %140, %5 : vector<32x32xf32>
    %142 = arith.addf %138, %141 : vector<32x32xf32>
    %c0_106 = arith.constant 0 : index
    %c6_107 = arith.constant 6 : index
    %c0_108 = arith.constant 0 : index
    %c0_109 = arith.constant 0 : index
    %143 = vector.load %arg6[%c0_106, %c6_107, %c0_108, %c0_109] : memref<1x8x32x32xf32, #tpu.memory_space<vmem>>, vector<1x1x32x32xf32>
    %144 = vector.shape_cast %143 : vector<1x1x32x32xf32> to vector<32x32xf32>
    %145 = vector.shape_cast %142 : vector<32x32xf32> to vector<1x1x32x32xf32>
    tpu.vector_store %arg6[%c0_106, %c6_107, %c0_108, %c0_109], %145 {strides = array<i32>} : memref<1x8x32x32xf32, #tpu.memory_space<vmem>>, vector<1x1x32x32xf32>,
    %c0_110 = arith.constant 0 : index
    %c7 = arith.constant 7 : index
    %c0_111 = arith.constant 0 : index
    %c0_112 = arith.constant 0 : index
    %146 = vector.load %arg3[%c0_110, %c7, %c0_111, %c0_112] : memref<1x8x32x32xf32, #tpu.memory_space<vmem>>, vector<1x1x32x32xf32>
    %147 = vector.shape_cast %146 : vector<1x1x32x32xf32> to vector<32x32xf32>
    %c7_113 = arith.constant 7 : index
    %148 = memref.load %arg5[%c7_113] : memref<8xf32, #tpu.memory_space<smem>>
    %149 = vector.broadcast %148 : f32 to vector<32x32xf32>
    %150 = arith.addf %147, %149 : vector<32x32xf32>
    %c7_114 = arith.constant 7 : index
    %c0_115 = arith.constant 0 : index
    %151 = memref.load %arg4[%c7_114, %c0_115] : memref<8x3xf32, #tpu.memory_space<smem>>
    %152 = vector.broadcast %151 : f32 to vector<32x32xf32>
    %153 = arith.mulf %152, %1 : vector<32x32xf32>
    %154 = arith.addf %150, %153 : vector<32x32xf32>
    %c7_116 = arith.constant 7 : index
    %c1_117 = arith.constant 1 : index
    %155 = memref.load %arg4[%c7_116, %c1_117] : memref<8x3xf32, #tpu.memory_space<smem>>
    %156 = vector.broadcast %155 : f32 to vector<32x32xf32>
    %157 = arith.mulf %156, %3 : vector<32x32xf32>
    %158 = arith.addf %154, %157 : vector<32x32xf32>
    %c7_118 = arith.constant 7 : index
    %c2_119 = arith.constant 2 : index
    %159 = memref.load %arg4[%c7_118, %c2_119] : memref<8x3xf32, #tpu.memory_space<smem>>
    %160 = vector.broadcast %159 : f32 to vector<32x32xf32>
    %161 = arith.mulf %160, %5 : vector<32x32xf32>
    %162 = arith.addf %158, %161 : vector<32x32xf32>
    %c0_120 = arith.constant 0 : index
    %c7_121 = arith.constant 7 : index
    %c0_122 = arith.constant 0 : index
    %c0_123 = arith.constant 0 : index
    %163 = vector.load %arg6[%c0_120, %c7_121, %c0_122, %c0_123] : memref<1x8x32x32xf32, #tpu.memory_space<vmem>>, vector<1x1x32x32xf32>
    %164 = vector.shape_cast %163 : vector<1x1x32x32xf32> to vector<32x32xf32>
    %165 = vector.shape_cast %162 : vector<32x32xf32> to vector<1x1x32x32xf32>
    tpu.vector_store %arg6[%c0_120, %c7_121, %c0_122, %c0_123], %165 {strides = array<i32>} : memref<1x8x32x32xf32, #tpu.memory_space<vmem>>, vector<1x1x32x32xf32>,
    return
  }
  func.func @transform_0(%arg0: i32, %arg1: i32) -> (i32, i32, i32, i32) {
    %c0_i32 = arith.constant 0 : i32
    %c0_i32_0 = arith.constant 0 : i32
    %c0_i32_1 = arith.constant 0 : i32
    return %arg0, %c0_i32, %arg1, %c0_i32_0 : i32, i32, i32, i32
  }
  func.func @transform_1(%arg0: i32, %arg1: i32) -> (i32, i32, i32, i32) {
    %c0_i32 = arith.constant 0 : i32
    %c0_i32_0 = arith.constant 0 : i32
    %c0_i32_1 = arith.constant 0 : i32
    return %arg0, %c0_i32, %arg1, %c0_i32_0 : i32, i32, i32, i32
  }
  func.func @transform_2(%arg0: i32, %arg1: i32) -> (i32, i32) {
    %c0_i32 = arith.constant 0 : i32
    %c0_i32_0 = arith.constant 0 : i32
    %c0_i32_1 = arith.constant 0 : i32
    return %c0_i32, %c0_i32_0 : i32, i32
  }
  func.func @transform_3(%arg0: i32, %arg1: i32) -> i32 {
    %c0_i32 = arith.constant 0 : i32
    %c0_i32_0 = arith.constant 0 : i32
    return %c0_i32 : i32
  }
  func.func @transform_4(%arg0: i32, %arg1: i32) -> (i32, i32, i32, i32) {
    %c0_i32 = arith.constant 0 : i32
    %c0_i32_0 = arith.constant 0 : i32
    %c0_i32_1 = arith.constant 0 : i32
    return %arg0, %c0_i32, %arg1, %c0_i32_0 : i32, i32, i32, i32
  }
}

</mosaic_0001>

<bundles_post_ra>
// kernel: tpu_custom_call.1
= control target key start
LH: loop header
LB: loop body
LE: loop exit
PB: predicated region body
PF: predicated region fallthrough
CT: control target
= control target key end

     0   :  { %s1859_s0 = inlined_call_operand.hbm [shape: f32[2,3,32,32], index: 0, kind: input, shape index: {}]   ;;  %s1860_s1 = inlined_call_operand.hbm [shape: f32[2,8,32,32], index: 1, kind: input, shape index: {}]   ;;  %s1861_s2 = inlined_call_operand.vmem [shape: f32[8,3], index: 2, kind: input, shape index: {}]   ;;  %s1862_s3 = inlined_call_operand.vmem [shape: f32[8], index: 3, kind: input, shape index: {}]   ;;  %s1863_s4 = inlined_call_operand.hbm [shape: f32[2,8,32,32], index: 4, kind: output, shape index: {}]  }
   0x1   :  { %1870 = sst [smem:[#allocation17_spill]] %s1859_s0 }
   0x2   :  { %1871 = sst [smem:[#allocation18_spill]] %s1861_s2 }
   0x3   :  { %1872 = sst [smem:[#allocation19_spill]] %s1862_s3 }
   0x4   :  { %9 = vsyncpa [#allocation3], 0 }
   0x5   :  { %11 = vsyncpa [#allocation3 + $0x1], 0 }
   0x6   :  { %12 = vsyncpa [#allocation7], 0 }
   0x7   :  { %14 = vsyncpa [#allocation7 + $0x1], 0 }
   0x8   :  { %15 = vsyncpa [#allocation5], 0 }
   0x9   :  { %16 = vsyncpa [#allocation10], 0 }
   0xa   :  { %17 = vsyncpa [#allocation4], 0 }
   0xb   :  { %19 = vsyncpa [#allocation4 + $0x1], 0  ;;  %s1271_s15 = smov 0   ;;  %s1273_s16 = smov 0  }
   0xc   :  { %s1275_s17 = smov 0   ;;  %s1277_s18 = smov 0  }
   0xd   :  { %s1279_s19 = smov 0   ;;  %s1281_s20 = smov 0  }
   0xe LB: > { %s840_s21 = sadd.s32 4294967295, %s1235_s20   ;;  %s841_s22 = sadd.s32 4294967294, %s1235_s20   ;;  %s1235_s20 = sphi %s1281_s20, %s25_s20   ;;  %s1231_s19 = sphi %s1279_s19, %s1895_s19   ;;  %s1227_s18 = sphi %s1277_s18, %s1894_s18   ;;  %s1223_s17 = sphi %s1275_s17, %s1893_s17   ;;  %s1219_s16 = sphi %s1273_s16, %s1892_s16   ;;  %s1215_s15 = sphi %s1271_s15, %s1891_s15  }
   0xf   : > { %s46_s23 = sadd.s32 1, %s1223_s17  ;;  %p53_p0 = scmp.ne.s32.totalorder %s1223_s17, %s1219_s16 }
  0x10   : > { %p54_p1 = scmp.eq.s32.totalorder %s1235_s20, 0  ;;  %p59_p2 = scmp.ne.s32.totalorder %s1219_s16, %s1215_s15 }
  0x11   : > { %p1309_p3 = scmp.eq.s32.totalorder %s840_s21, 0  ;;  %p155_p4 = scmp.eq.s32.totalorder %s840_s21, 1 }
  0x12   : > { %p1313_p5 = por %p54_p1, %p53_p0  ;;  %p161_p6 = scmp.eq.s32.totalorder %s841_s22, 1 }
  0x13   : > { %s1873_s24 = scalar_select %p1309_p3, 1, 0 }
  0x14   : > { %p1319_p7 = por %p1309_p3, %p59_p2  ;;  %p1323_p8 = por %p155_p4, %p53_p0 }
  0x15   : > { %p1327_p9 = por %p161_p6, %p59_p2  ;;  %p842_p10 = scmp.ge.s32.totalorder %s1235_s20, 1 }
  0x16   : > { %s1875_s26 = scalar_select %p1319_p7, 1, 0 }
  0x17   : > { %s1876_s27 = scalar_select %p1323_p8, 1, 0 }
  0x18   : > { %s1877_s28 = scalar_select %p1327_p9, 1, 0 }
  0x19   : > { %p168_p11 = scmp.lt.s32.totalorder %s1235_s20, 3  ;;  %s1878_s2 = sld [smem:[#allocation18_spill]] }
  0x1a   : > { %p993_p0 = scmp.lt.s32.totalorder %s1235_s20, 2  ;;  %s1880_s3 = sld [smem:[#allocation19_spill]] }
  0x1b   : > { %p1336_p12 = pnand %p842_p10, %p168_p11 }
  0x1c   : > { %p1349_p2 = pnand %p993_p0, %p1313_p5 }
  0x1d   : > { %s1879_s6 = scalar_select %p1336_p12, 1, 0 }
  0x1e   : > { %p973_p1 = pneg %p1336_p12 }
  0x1f   : > { %s181_s5 = sshll.u32 %s1878_s2, 4  ;;  %s182_s5 = int_to_ptr.vmem [resolvable:$true] %s181_s5 }
  0x20   : > { %s192_s9 = sshll.u32 %s1880_s3, 4  ;;  %p1355_p4 = pnand %p973_p1, %p1309_p3  ;;  %s193_s9 = int_to_ptr.vmem [resolvable:$true] %s192_s9 }
  0x21   : > { %s1881_s10 = scalar_select %p1349_p2, 1, 0 }
  0x22   : > { %s1051_s12 = scalar_lea.vmem %s182_s5, 128  ;;  %p1053_p10 = pneg %p1355_p4 }
  0x23   : > { %p1052_p6 = scmp.ne.s32.totalorder %s182_s5, %s1051_s12  ;;  %p1059_p9 = scmp.lt.s32.totalorder %s182_s5, %s182_s5 }
  0x24   : > { %p1060_p8 = scmp.lt.s32.totalorder %s1051_s12, %s1051_s12 }
  0x25   : > { %p1054_p11 = pnand %p1053_p10, %p1052_p6 }
  0x26   : > { %p1061_p7 = por %p1060_p8, %p1059_p9 }
  0x27   : > { %p1055_p13 = pneg %p1054_p11 }
  0x29   : > { %p1062_p5 = pnand %p1061_p7, %p1055_p13 }
  0x2b   : > { %1065 = shalt.err (!%p1062_p5)
}
  0x2c   : > { %s1237_s13 = smov [#allocation8]   ;;  %s1066_s14 = scalar_lea.vmem %s193_s9, 16 }
  0x2d   : > { %976 = dma.vmem_to_smem (!%p1355_p4), %s182_s5, 128, %s1237_s13, [#allocation5]  }
  0x2e   : > { %p1067_p0 = scmp.ne.s32.totalorder %s193_s9, %s1066_s14  ;;  %p1074_p12 = scmp.lt.s32.totalorder %s193_s9, %s193_s9 }
  0x2f   : > { %p1075_p2 = scmp.lt.s32.totalorder %s1066_s14, %s1066_s14 }
  0x30   : > { %p1069_p1 = pnand %p1067_p0, %p1053_p10 }
  0x31   : > { %p1076_p6 = por %p1075_p2, %p1074_p12 }
  0x32   : > { %p1070_p3 = pneg %p1069_p1 }
  0x34   : > { %p1077_p11 = pnand %p1076_p6, %p1070_p3 }
  0x36   : > { %1080 = shalt.err (!%p1077_p11)
}
  0x37   : > { %s1238_s21 = smov [#allocation9]   ;;  %s37_s22 = sadd.s32 1, %s1231_s19 }
  0x38   : > { %979 = dma.vmem_to_smem (!%p1355_p4), %s193_s9, 16, %s1238_s21, [#allocation10]  }
  0x39   : > { %s1367_s25 = sand.u32 1, %s1223_s17   ;;  %p39_p7 = scmp.ge.s32.totalorder %s37_s22, 2 }
  0x3a   : > { %s956_s29 = smul.u32 96, %s1367_s25  ;;  %s1883_s0 = sld [smem:[#allocation17_spill]] }
  0x3b   : > { %s1897_s22 = smov (%p39_p7, %s37_s22), 0  ;;  %s957_s30 = smul.u32 1536, %s1231_s19 }
  0x3c   : > { %s41_s5 = ssub.s32 %s1231_s19, %s1897_s22  ;;  %s207_s7 = scalar_lea.vmem [#allocation2], %s956_s29 }
  0x3d   : > { %s216_s8 = sshll.u32 %s207_s7, 4  ;;  %p44_p3 = scmp.eq.s32.totalorder %s41_s5, 0  ;;  %s1380_s8 = int_to_ptr.vmem [resolvable:$true] %s216_s8 }
  0x3e   : > { %s204_s14 = scalar_lea.sflag [#allocation3], %s1367_s25  ;;  %p1884_p9 = scmp.ne.s32.totalorder %s1881_s10, 0 }
  0x3f   : > { %s1385_s13 = scalar_select %p44_p3, %s1223_s17, %s46_s23  }
  0x40   : > { %s1378_s9 = scalar_lea.hbm %s1883_s0, %s957_s30  ;;  %p1083_p12 = pneg %p1884_p9 }
  0x41   : > { %s1081_s21 = scalar_lea.hbm %s1378_s9, 1536  ;;  %s1086_s5 = scalar_lea.hbm %s1883_s0, 3072 }
  0x42   : > { %p1082_p8 = scmp.ne.s32.totalorder %s1378_s9, %s1081_s21  ;;  %p1087_p4 = scmp.lt.u32.totalorder %s1378_s9, %s1883_s0 }
  0x43   : > { %p1088_p10 = scmp.lt.u32.totalorder %s1086_s5, %s1081_s21  ;;  %p1090_p0 = scmp.lt.u32.totalorder %s1081_s21, %s1378_s9 }
  0x44   : > { %p1084_p13 = pnand %p1083_p12, %p1082_p8 }
  0x45   : > { %p1089_p5 = por %p1088_p10, %p1087_p4 }
  0x46   : > { %p1085_p2 = pneg %p1084_p13 }
  0x47   : > { %p1091_p1 = por %p1090_p0, %p1089_p5 }
  0x49   : > { %p1092_p6 = pnand %p1091_p1, %p1085_p2 }
  0x4b   : > { %1095 = shalt.err (!%p1092_p6)
}
  0x4c   : > { %s1096_s23 = scalar_lea.vmem %s1380_s8, 1536  ;;  %s1239_s12 = smov [#allocation2]  }
  0x4d   : > { %p1097_p11 = scmp.ne.s32.totalorder %s1380_s8, %s1096_s23  ;;  %s1101_s29 = sshll.u32 %s1239_s12, 4  ;;  %s1102_s29 = int_to_ptr.vmem [resolvable:$false] %s1101_s29 }
  0x4e   : > { %s1103_s30 = scalar_lea.vmem %s1102_s29, 3072  ;;  %p1104_p8 = scmp.lt.s32.totalorder %s1380_s8, %s1102_s29 }
  0x4f   : > { %p1099_p7 = pnand %p1097_p11, %p1083_p12  ;;  %p1105_p13 = scmp.lt.s32.totalorder %s1103_s30, %s1096_s23 }
  0x51   : > { %p1100_p3 = pneg %p1099_p7  ;;  %p1106_p4 = por %p1105_p13, %p1104_p8 }
  0x53   : > { %p1107_p10 = pnand %p1106_p4, %p1100_p3 }
  0x55   : > { %1110 = shalt.err (!%p1107_p10)
}
  0x56   : > { %s1240_s21 = smov 128   ;;  %s1241_s5 = smov 8  }
  0x57   : > { %983 = dma.hbm_to_vmem [thread:$0]  (!%p1884_p9), %s1378_s9, 1536, %s1380_s8, %s204_s14, %s1240_s21, %s1240_s21, %s1241_s5  }
  0x58   : > { %s847_s7 = sshll.u32 %s1367_s25, 8  ;;  %s954_s11 = sshll.u32 %s1231_s19, 12 }
  0x59   : > { %s1423_s29 = scalar_lea.hbm %s1860_s1, %s954_s11  ;;  %s230_s30 = scalar_lea.vmem [#allocation6], %s847_s7 }
  0x5a   : > { %s239_s0 = sshll.u32 %s230_s30, 4  ;;  %s227_s2 = scalar_lea.sflag [#allocation7], %s1367_s25  ;;  %s1425_s0 = int_to_ptr.vmem [resolvable:$true] %s239_s0 }
  0x5b   : > { %s1111_s3 = scalar_lea.hbm %s1423_s29, 4096  ;;  %s1116_s14 = scalar_lea.hbm %s1860_s1, 8192 }
  0x5c   : > { %p1112_p2 = scmp.ne.s32.totalorder %s1423_s29, %s1111_s3  ;;  %p1117_p1 = scmp.lt.u32.totalorder %s1423_s29, %s1860_s1 }
  0x5d   : > { %p1118_p6 = scmp.lt.u32.totalorder %s1116_s14, %s1111_s3  ;;  %p1120_p7 = scmp.lt.u32.totalorder %s1111_s3, %s1423_s29 }
  0x5e   : > { %p1114_p5 = pnand %p1112_p2, %p1083_p12 }
  0x5f   : > { %p1119_p11 = por %p1118_p6, %p1117_p1 }
  0x60   : > { %p1115_p0 = pneg %p1114_p5 }
  0x61   : > { %p1121_p3 = por %p1120_p7, %p1119_p11 }
  0x63   : > { %p1122_p8 = pnand %p1121_p3, %p1115_p0 }
  0x65   : > { %1125 = shalt.err (!%p1122_p8)
}
  0x66   : > { %s1126_s7 = scalar_lea.vmem %s1425_s0, 4096  ;;  %s1242_s12 = smov [#allocation6]  }
  0x67   : > { %p1127_p13 = scmp.ne.s32.totalorder %s1425_s0, %s1126_s7  ;;  %s1131_s30 = sshll.u32 %s1242_s12, 4  ;;  %s1132_s30 = int_to_ptr.vmem [resolvable:$false] %s1131_s30 }
  0x68   : > { %s1133_s8 = scalar_lea.vmem %s1132_s30, 8192  ;;  %p1134_p2 = scmp.lt.s32.totalorder %s1425_s0, %s1132_s30 }
  0x69   : > { %p1129_p4 = pnand %p1127_p13, %p1083_p12  ;;  %p1135_p5 = scmp.lt.s32.totalorder %s1133_s8, %s1126_s7 }
  0x6b   : > { %p1130_p10 = pneg %p1129_p4  ;;  %p1136_p1 = por %p1135_p5, %p1134_p2 }
  0x6d   : > { %p1137_p6 = pnand %p1136_p1, %p1130_p10 }
  0x6f   : > { %1140 = shalt.err (!%p1137_p6)
}
  0x70   : > { %986 = dma.hbm_to_vmem [thread:$0]  (!%p1884_p9), %s1423_s29, 4096, %s1425_s0, %s227_s2, %s1240_s21, %s1240_s21, %s1241_s5  }
  0x71   : > { %p1885_p12 = scmp.ne.s32.totalorder %s1879_s6, 0 }
  0x72   : > { %s1459_s3 = sand.u32 (!%p1885_p12), 1, %s1219_s16   ;;  %p1886_p0 = scmp.ne.s32.totalorder (!%p1885_p12), %s1875_s26, 0 }
  0x73   : > { %251 = sbr.rel (%p1885_p12) target bundleno = 223 (0xdf), region = 36  ;;  %s254_s14 = scalar_lea.sflag (!%p1885_p12), [#allocation3], %s1459_s3 }
  0x74   : > { %s958_s9 = smul.u32 (!%p1885_p12), 96, %s1459_s3 }
  0x76   : > { %s1463_s10 = scalar_lea.vmem (!%p1885_p12), [#allocation2], %s958_s9 }
  0x7a   : > { %1194 = dma.done.wait (%p1886_p0), %s254_s14, 1536  }
  0x7b   : > { %1196 = vsyncadd (%p1886_p0), %s254_s14, 4294965760  ;;  %s851_s0 = sshll.u32 %s1459_s3, 8  ;;  %s263_s2 = scalar_lea.sflag [#allocation7], %s1459_s3 }
  0x7c   : > { %s1473_s6 = scalar_lea.vmem [#allocation6], %s851_s0 }
  0x7d   : > { %1198 = dma.done.wait (%p1886_p0), %s263_s2, 4096  }
  0x7e   : > { %1200 = vsyncadd (%p1886_p0), %s263_s2, 4294963200  ;;  %p1887_p9 = scmp.ne.s32.totalorder %s1873_s24, 0 }
  0x80   : > { %1202 = dma.done.wait (%p1887_p9), [#allocation5], 128  }
  0x81   : > { %1204 = vsyncadd (%p1887_p9), [#allocation5], 4294967168 }
  0x82   : > { %1206 = dma.done.wait (%p1887_p9), [#allocation10], 16  }
  0x83   : > { %1208 = vsyncadd (%p1887_p9), [#allocation10], 4294967280 }
  0x84   : > { %279 = sfence }
  0x85   : > { %s326_s25 = sld [smem:[#allocation9]]  ;;  %s863_s21 = sld [smem:[#allocation8 + $0x1]]  ;;  %v1488_v0 = vld [vmem:[%s1463_s10] sm:$0xff]  ;;  %v323_v4 = vld [vmem:[%s1473_s6 + $0x8] sm:$0xff]  ;;  %vm362_vm0 = vcmask 261120   ;;  %v1514_v9 = vld [vmem:[%s1463_s10 + $0x10] sm:$0xff] }
  0x86   : > { %s332_s26 = sld [smem:[#allocation8]]  ;;  %s864_s5 = sld [smem:[#allocation8 + $0x2]]  ;;  %v1491_v1 = vld [vmem:[%s1463_s10 + $0x20] sm:$0xff]  ;;  %v1501_v5 = vld [vmem:[%s1463_s10 + $0x8] sm:$0xff]  ;;  %v324_v10 = vld [vmem:[%s1473_s6 + $0x10] sm:$0xff] }
  0x87   : > { %v1494_v2 = vld [vmem:[%s1463_s10 + $0x40] sm:$0xff]  ;;  %s1498_s24 = sld [smem:[#allocation9 + $0x1]]  ;;  %v1504_v6 = vld [vmem:[%s1463_s10 + $0x28] sm:$0xff]  ;;  %s1506_s29 = sld [smem:[#allocation8 + $0x80]]  ;;  %v1518_v15 = vld [vmem:[%s1463_s10 + $0x30] sm:$0xff] }
  0x88   : > { %v322_v3 = vld [vmem:[%s1473_s6] sm:$0xff]  ;;  %s1508_s11 = sld [smem:[#allocation8 + $0x81]]  ;;  %v1511_v8 = vld [vmem:[%s1463_s10 + $0x48] sm:$0xff]  ;;  %v1521_v16 = vld [vmem:[%s1463_s10 + $0x50] sm:$0xff]  ;;  %s1523_s23 = sld [smem:[#allocation8 + $0x82]] }
  0x89   : > { %v1529_v21 = vld [vmem:[%s1463_s10 + $0x18] sm:$0xff]  ;;  %v865_v37 = vld [vmem:[%s1473_s6 + $0x20] sm:$0xff]  ;;  %v866_v46 = vld [vmem:[%s1473_s6 + $0x28] sm:$0xff]  ;;  %s1552_s7 = sld [smem:[#allocation9 + $0x2]]  ;;  %s1554_s12 = sld [smem:[#allocation8 + $0x100]] }
  0x8a   : > { %v1532_v22 = vld [vmem:[%s1463_s10 + $0x38] sm:$0xff]  ;;  %v867_v55 = vld [vmem:[%s1473_s6 + $0x30] sm:$0xff]  ;;  %s1560_s30 = sld [smem:[#allocation8 + $0x101]]  ;;  %s1562_s8 = sld [smem:[#allocation8 + $0x102]] }
  0x8b   : > { %v327_v7 = vstv %s326_s25  ;;  %v343_v13 = vstv %s863_s21  ;;  %v325_v23 = vld [vmem:[%s1473_s6 + $0x18] sm:$0xff]  ;;  %s1566_s9 = scalar_lea.vmem [#allocation11], %s851_s0  ;;  %s1591_s14 = sld [smem:[#allocation9 + $0x3]] }
  0x8c   : > { %v328_v11 = vadd.f32 %v327_v7, %v322_v3  ;;  %v333_v12 = vstv %s332_s26  ;;  %v329_v14 = vadd.f32 %v327_v7, %v323_v4  ;;  %v344_v18 = vmul.f32 %v1491_v1, %v343_v13  ;;  %v1539_v28 = vld [vmem:[%s1463_s10 + $0x58] sm:$0xff]  ;;  %s1593_s10 = sld [smem:[#allocation8 + $0x180]]  ;;  %s1596_s0 = sld [smem:[#allocation8 + $0x181]] }
  0x8d   : > { %v334_v17 = vmul.f32 %v333_v12, %v1488_v0  ;;  %v353_v19 = vstv %s864_s5  ;;  %v335_v20 = vmul.f32 %v333_v12, %v1501_v5  ;;  %v345_v25 = vmul.f32 %v1504_v6, %v343_v13  ;;  %v868_v60 = vld [vmem:[%s1473_s6 + $0x38] sm:$0xff]  ;;  %s1603_s2 = sld [smem:[#allocation8 + $0x182]]  ;;  %s1627_s25 = sld [smem:[#allocation9 + $0x4]] }
  0x8e   : > { %v354_v24 = vmul.f32 %v1494_v2, %v353_v19  ;;  %v355_v26 = vmul.f32 %v1511_v8, %v353_v19  ;;  %v330_v27 = vadd.f32 %v327_v7, %v324_v10  ;;  %v336_v31 = vmul.f32 %v333_v12, %v1514_v9  ;;  %s1629_s26 = sld [smem:[#allocation8 + $0x200]]  ;;  %s1635_s21 = sld [smem:[#allocation8 + $0x201]] }
  0x8f   : > { %v338_v29 = vadd.f32 %v334_v17, %v328_v11  ;;  %v339_v30 = vadd.f32 %v335_v20, %v329_v14  ;;  %v346_v32 = vmul.f32 %v1518_v15, %v343_v13  ;;  %v356_v33 = vmul.f32 %v1521_v16, %v353_v19  ;;  %s1640_s5 = sld [smem:[#allocation8 + $0x202]]  ;;  %p1888_p7 = scmp.ne.s32.totalorder %s1876_s27, 0 }
  0x90   : > { %v331_v34 = vadd.f32 %v327_v7, %v325_v23  ;;  %v337_v35 = vmul.f32 %v333_v12, %v1529_v21  ;;  %v347_v36 = vmul.f32 %v1532_v22, %v343_v13  ;;  %v340_v40 = vadd.f32 %v336_v31, %v330_v27 }
  0x91   : > { %v348_v38 = vadd.f32 %v344_v18, %v338_v29  ;;  %v349_v39 = vadd.f32 %v345_v25, %v339_v30  ;;  %v357_v41 = vmul.f32 %v1539_v28, %v353_v19  ;;  %v373_v43 = vstv %s1498_s24  ;;  %v877_v18 = vld [vmem:[%s1473_s6 + $0x40] sm:$0xff]  ;;  %v878_v25 = vld [vmem:[%s1473_s6 + $0x48] sm:$0xff]  ;;  %s1663_s24 = sld [smem:[#allocation9 + $0x5]] }
  0x92   : > { %v341_v42 = vadd.f32 %v337_v35, %v331_v34  ;;  %v379_v44 = vstv %s1506_s29  ;;  %v389_v45 = vstv %s1508_s11  ;;  %v350_v49 = vadd.f32 %v346_v32, %v340_v40  ;;  %s1665_s29 = sld [smem:[#allocation8 + $0x280]]  ;;  %s1671_s11 = sld [smem:[#allocation8 + $0x281]] }
  0x93   : > { %v358_v47 = vadd.f32 %v354_v24, %v348_v38  ;;  %v359_v48 = vadd.f32 %v355_v26, %v349_v39  ;;  %v374_v50 = vadd.f32 %v865_v37, %v373_v43  ;;  %v380_v52 = vmul.f32 %v379_v44, %v1488_v0  ;;  %v879_v39 = vld [vmem:[%s1473_s6 + $0x50] sm:$0xff] }
  0x94   : > { %v351_v51 = vadd.f32 %v347_v36, %v341_v42  ;;  %v390_v53 = vmul.f32 %v1491_v1, %v389_v45  ;;  %v399_v54 = vstv %s1523_s23  ;;  %v360_v56 = vadd.f32 %v356_v33, %v350_v49  ;;  %s1676_s23 = sld [smem:[#allocation8 + $0x282]] }
  0x95   : > { %363 = vst.msk [vmem:[%s1566_s9] sm:$0xff] %vm362_vm0, %v358_v47  ;;  %364 = vst.msk [vmem:[%s1566_s9 + $0x8] sm:$0xff] %vm362_vm0, %v359_v48  ;;  %v400_v57 = vmul.f32 %v1494_v2, %v399_v54  ;;  %v375_v58 = vadd.f32 %v866_v46, %v373_v43  ;;  %v381_v59 = vmul.f32 %v379_v44, %v1501_v5  ;;  %v419_v29 = vstv %s1552_s7  ;;  %s1699_s7 = sld [smem:[#allocation9 + $0x6]] }
  0x96   : > { %v361_v61 = vadd.f32 %v357_v41, %v351_v51  ;;  %v384_v62 = vadd.f32 %v380_v52, %v374_v50  ;;  %v391_v63 = vmul.f32 %v1504_v6, %v389_v45  ;;  %v401_v3 = vmul.f32 %v1511_v8, %v399_v54  ;;  %365 = vst.msk [vmem:[%s1566_s9 + $0x10] sm:$0xff] %vm362_vm0, %v360_v56 }
  0x97   : > { %v385_v4 = vadd.f32 %v381_v59, %v375_v58  ;;  %v376_v7 = vadd.f32 %v867_v55, %v373_v43  ;;  %v382_v10 = vmul.f32 %v379_v44, %v1514_v9  ;;  %v392_v11 = vmul.f32 %v1518_v15, %v389_v45 }
  0x98   : > { %366 = vst.msk [vmem:[%s1566_s9 + $0x18] sm:$0xff] %vm362_vm0, %v361_v61  ;;  %v394_v12 = vadd.f32 %v390_v53, %v384_v62  ;;  %v402_v13 = vmul.f32 %v1521_v16, %v399_v54  ;;  %v377_v14 = vadd.f32 %v868_v60, %v373_v43  ;;  %v383_v17 = vmul.f32 %v379_v44, %v1529_v21  ;;  %v880_v44 = vld [vmem:[%s1473_s6 + $0x58] sm:$0xff] }
  0x99   : > { %v395_v19 = vadd.f32 %v391_v63, %v385_v4  ;;  %v386_v20 = vadd.f32 %v382_v10, %v376_v7  ;;  %v393_v23 = vmul.f32 %v1532_v22, %v389_v45  ;;  %v403_v24 = vmul.f32 %v1539_v28, %v399_v54  ;;  %v890_v7 = vld [vmem:[%s1473_s6 + $0x68] sm:$0xff] }
  0x9a   : > { %v404_v26 = vadd.f32 %v400_v57, %v394_v12  ;;  %v387_v27 = vadd.f32 %v383_v17, %v377_v14  ;;  %v425_v30 = vstv %s1554_s12  ;;  %v420_v33 = vadd.f32 %v877_v18, %v419_v29  ;;  %v889_v57 = vld [vmem:[%s1473_s6 + $0x60] sm:$0xff]  ;;  %s1701_s12 = sld [smem:[#allocation8 + $0x300]] }
  0x9b   : > { %v405_v31 = vadd.f32 %v401_v3, %v395_v19  ;;  %v396_v32 = vadd.f32 %v392_v11, %v386_v20  ;;  %v426_v34 = vmul.f32 %v425_v30, %v1488_v0  ;;  %v435_v36 = vstv %s1560_s30  ;;  %v891_v20 = vld [vmem:[%s1473_s6 + $0x70] sm:$0xff]  ;;  %s1707_s30 = sld [smem:[#allocation8 + $0x301]] }
  0x9c   : > { %873 = vst.msk [vmem:[%s1566_s9 + $0x20] sm:$0xff] %vm362_vm0, %v404_v26  ;;  %v397_v35 = vadd.f32 %v393_v23, %v387_v27  ;;  %v445_v37 = vstv %s1562_s8  ;;  %v421_v38 = vadd.f32 %v878_v25, %v419_v29  ;;  %v436_v42 = vmul.f32 %v1491_v1, %v435_v36  ;;  %v892_v27 = vld [vmem:[%s1473_s6 + $0x78] sm:$0xff]  ;;  %s1712_s8 = sld [smem:[#allocation8 + $0x302]] }
  0x9d   : > { %874 = vst.msk [vmem:[%s1566_s9 + $0x28] sm:$0xff] %vm362_vm0, %v405_v31  ;;  %v406_v40 = vadd.f32 %v402_v13, %v396_v32  ;;  %v430_v41 = vadd.f32 %v426_v34, %v420_v33  ;;  %v446_v43 = vmul.f32 %v1494_v2, %v445_v37  ;;  %v427_v46 = vmul.f32 %v425_v30, %v1501_v5 }
  0x9e   : > { %v407_v45 = vadd.f32 %v403_v24, %v397_v35  ;;  %v437_v47 = vmul.f32 %v1504_v6, %v435_v36  ;;  %v447_v48 = vmul.f32 %v1511_v8, %v445_v37  ;;  %v422_v50 = vadd.f32 %v879_v39, %v419_v29 }
  0x9f   : > { %875 = vst.msk [vmem:[%s1566_s9 + $0x30] sm:$0xff] %vm362_vm0, %v406_v40  ;;  %v440_v49 = vadd.f32 %v436_v42, %v430_v41  ;;  %v428_v51 = vmul.f32 %v425_v30, %v1514_v9  ;;  %v438_v52 = vmul.f32 %v1518_v15, %v435_v36  ;;  %v431_v53 = vadd.f32 %v427_v46, %v421_v38  ;;  %v901_v41 = vld [vmem:[%s1473_s6 + $0x80] sm:$0xff] }
  0xa0   : > { %876 = vst.msk [vmem:[%s1566_s9 + $0x38] sm:$0xff] %vm362_vm0, %v407_v45  ;;  %v448_v54 = vmul.f32 %v1521_v16, %v445_v37  ;;  %v423_v55 = vadd.f32 %v880_v44, %v419_v29  ;;  %v429_v56 = vmul.f32 %v425_v30, %v1529_v21  ;;  %v439_v60 = vmul.f32 %v1532_v22, %v435_v36 }
  0xa1   : > { %v450_v58 = vadd.f32 %v446_v43, %v440_v49  ;;  %v432_v59 = vadd.f32 %v428_v51, %v422_v50  ;;  %v449_v61 = vmul.f32 %v1539_v28, %v445_v37  ;;  %v441_v62 = vadd.f32 %v437_v47, %v431_v53  ;;  %v902_v50 = vld [vmem:[%s1473_s6 + $0x88] sm:$0xff] }
  0xa2   : > { %v433_v63 = vadd.f32 %v429_v56, %v423_v55  ;;  %v465_v3 = vstv %s1591_s14  ;;  %v471_v4 = vstv %s1593_s10  ;;  %v481_v13 = vstv %s1596_s0  ;;  %s1735_s14 = sld [smem:[#allocation9 + $0x7]]  ;;  %s1737_s10 = sld [smem:[#allocation8 + $0x380]] }
  0xa3   : > { %885 = vst.msk [vmem:[%s1566_s9 + $0x40] sm:$0xff] %vm362_vm0, %v450_v58  ;;  %v442_v10 = vadd.f32 %v438_v52, %v432_v59  ;;  %v466_v11 = vadd.f32 %v889_v57, %v465_v3  ;;  %v472_v12 = vmul.f32 %v471_v4, %v1488_v0  ;;  %v451_v14 = vadd.f32 %v447_v48, %v441_v62  ;;  %v903_v59 = vld [vmem:[%s1473_s6 + $0x90] sm:$0xff]  ;;  %s1743_s0 = sld [smem:[#allocation8 + $0x381]] }
  0xa4   : > { %v443_v17 = vadd.f32 %v439_v60, %v433_v63  ;;  %v482_v18 = vmul.f32 %v1491_v1, %v481_v13  ;;  %v491_v19 = vstv %s1603_s2  ;;  %v467_v26 = vadd.f32 %v890_v7, %v465_v3  ;;  %s1748_s2 = sld [smem:[#allocation8 + $0x382]] }
  0xa5   : > { %v452_v23 = vadd.f32 %v448_v54, %v442_v10  ;;  %v476_v24 = vadd.f32 %v472_v12, %v466_v11  ;;  %v492_v25 = vmul.f32 %v1494_v2, %v491_v19  ;;  %886 = vst.msk [vmem:[%s1566_s9 + $0x48] sm:$0xff] %vm362_vm0, %v451_v14  ;;  %v473_v30 = vmul.f32 %v471_v4, %v1501_v5 }
  0xa6   : > { %v453_v29 = vadd.f32 %v449_v61, %v443_v17  ;;  %v483_v31 = vmul.f32 %v1504_v6, %v481_v13  ;;  %v493_v32 = vmul.f32 %v1511_v8, %v491_v19  ;;  %v468_v34 = vadd.f32 %v891_v20, %v465_v3 }
  0xa7   : > { %887 = vst.msk [vmem:[%s1566_s9 + $0x50] sm:$0xff] %vm362_vm0, %v452_v23  ;;  %v486_v33 = vadd.f32 %v482_v18, %v476_v24  ;;  %v474_v35 = vmul.f32 %v471_v4, %v1514_v9  ;;  %v484_v36 = vmul.f32 %v1518_v15, %v481_v13  ;;  %v477_v37 = vadd.f32 %v473_v30, %v467_v26  ;;  %v913_v24 = vld [vmem:[%s1473_s6 + $0xa0] sm:$0xff] }
  0xa8   : > { %888 = vst.msk [vmem:[%s1566_s9 + $0x58] sm:$0xff] %vm362_vm0, %v453_v29  ;;  %v494_v38 = vmul.f32 %v1521_v16, %v491_v19  ;;  %v469_v39 = vadd.f32 %v892_v27, %v465_v3  ;;  %v475_v40 = vmul.f32 %v471_v4, %v1529_v21  ;;  %v485_v44 = vmul.f32 %v1532_v22, %v481_v13  ;;  %v904_v3 = vld [vmem:[%s1473_s6 + $0x98] sm:$0xff] }
  0xa9   : > { %v496_v42 = vadd.f32 %v492_v25, %v486_v33  ;;  %v478_v43 = vadd.f32 %v474_v35, %v468_v34  ;;  %v495_v45 = vmul.f32 %v1539_v28, %v491_v19  ;;  %v487_v46 = vadd.f32 %v483_v31, %v477_v37  ;;  %v914_v34 = vld [vmem:[%s1473_s6 + $0xa8] sm:$0xff] }
  0xaa   : > { %v479_v47 = vadd.f32 %v475_v40, %v469_v39  ;;  %v511_v48 = vstv %s1627_s25  ;;  %v517_v49 = vstv %s1629_s26  ;;  %v527_v54 = vstv %s1635_s21  ;;  %s705_s25 = sshll.u32 %s1566_s9, 4  ;;  %s1804_s25 = int_to_ptr.vmem [resolvable:$true] %s705_s25 }
  0xab   : > { %897 = vst.msk [vmem:[%s1566_s9 + $0x60] sm:$0xff] %vm362_vm0, %v496_v42  ;;  %v488_v51 = vadd.f32 %v484_v36, %v478_v43  ;;  %v512_v52 = vadd.f32 %v901_v41, %v511_v48  ;;  %v518_v53 = vmul.f32 %v517_v49, %v1488_v0  ;;  %v497_v55 = vadd.f32 %v493_v32, %v487_v46  ;;  %v915_v43 = vld [vmem:[%s1473_s6 + $0xb0] sm:$0xff] }
  0xac   : > { %v489_v56 = vadd.f32 %v485_v44, %v479_v47  ;;  %v528_v57 = vmul.f32 %v1491_v1, %v527_v54  ;;  %v537_v58 = vstv %s1640_s5  ;;  %v513_v63 = vadd.f32 %v902_v50, %v511_v48 }
  0xad   : > { %v498_v60 = vadd.f32 %v494_v38, %v488_v51  ;;  %v522_v61 = vadd.f32 %v518_v53, %v512_v52  ;;  %v538_v62 = vmul.f32 %v1494_v2, %v537_v58  ;;  %898 = vst.msk [vmem:[%s1566_s9 + $0x68] sm:$0xff] %vm362_vm0, %v497_v55  ;;  %v519_v7 = vmul.f32 %v517_v49, %v1501_v5 }
  0xae   : > { %v499_v4 = vadd.f32 %v495_v45, %v489_v56  ;;  %v529_v10 = vmul.f32 %v1504_v6, %v527_v54  ;;  %v539_v11 = vmul.f32 %v1511_v8, %v537_v58  ;;  %v514_v13 = vadd.f32 %v903_v59, %v511_v48 }
  0xaf   : > { %899 = vst.msk [vmem:[%s1566_s9 + $0x70] sm:$0xff] %vm362_vm0, %v498_v60  ;;  %v532_v12 = vadd.f32 %v528_v57, %v522_v61  ;;  %v520_v14 = vmul.f32 %v517_v49, %v1514_v9  ;;  %v530_v17 = vmul.f32 %v1518_v15, %v527_v54  ;;  %v523_v18 = vadd.f32 %v519_v7, %v513_v63  ;;  %v925_v61 = vld [vmem:[%s1473_s6 + $0xc0] sm:$0xff] }
  0xb0   : > { %900 = vst.msk [vmem:[%s1566_s9 + $0x78] sm:$0xff] %vm362_vm0, %v499_v4  ;;  %v540_v19 = vmul.f32 %v1521_v16, %v537_v58  ;;  %v515_v20 = vadd.f32 %v904_v3, %v511_v48  ;;  %v521_v23 = vmul.f32 %v517_v49, %v1529_v21  ;;  %v531_v27 = vmul.f32 %v1532_v22, %v527_v54  ;;  %v916_v48 = vld [vmem:[%s1473_s6 + $0xb8] sm:$0xff] }
  0xb1   : > { %v542_v25 = vadd.f32 %v538_v62, %v532_v12  ;;  %v524_v26 = vadd.f32 %v520_v14, %v514_v13  ;;  %v541_v29 = vmul.f32 %v1539_v28, %v537_v58  ;;  %v533_v30 = vadd.f32 %v529_v10, %v523_v18  ;;  %v926_v13 = vld [vmem:[%s1473_s6 + $0xc8] sm:$0xff] }
  0xb2   : > { %v525_v31 = vadd.f32 %v521_v23, %v515_v20  ;;  %v557_v32 = vstv %s1663_s24  ;;  %v563_v33 = vstv %s1665_s29  ;;  %v573_v38 = vstv %s1671_s11  ;;  %s1141_s24 = scalar_lea.vmem %s1804_s25, 4096  ;;  %s1243_s29 = smov [#allocation11]  }
  0xb3   : > { %909 = vst.msk [vmem:[%s1566_s9 + $0x80] sm:$0xff] %vm362_vm0, %v542_v25  ;;  %v534_v35 = vadd.f32 %v530_v17, %v524_v26  ;;  %v558_v36 = vadd.f32 %v913_v24, %v557_v32  ;;  %v564_v37 = vmul.f32 %v563_v33, %v1488_v0  ;;  %v543_v39 = vadd.f32 %v539_v11, %v533_v30  ;;  %v927_v26 = vld [vmem:[%s1473_s6 + $0xd0] sm:$0xff]  ;;  %p1142_p11 = scmp.ne.s32.totalorder %s1804_s25, %s1141_s24  ;;  %s1145_s11 = sshll.u32 %s1243_s29, 4  ;;  %s1146_s11 = int_to_ptr.vmem [resolvable:$false] %s1145_s11 }
  0xb4   : > { %v535_v40 = vadd.f32 %v531_v27, %v525_v31  ;;  %v574_v41 = vmul.f32 %v1491_v1, %v573_v38  ;;  %v583_v42 = vstv %s1676_s23  ;;  %v559_v47 = vadd.f32 %v914_v34, %v557_v32  ;;  %s1147_s23 = scalar_lea.vmem %s1146_s11, 8192  ;;  %p1148_p13 = scmp.lt.s32.totalorder %s1804_s25, %s1146_s11 }
  0xb5   : > { %v544_v44 = vadd.f32 %v540_v19, %v534_v35  ;;  %v568_v45 = vadd.f32 %v564_v37, %v558_v36  ;;  %v584_v46 = vmul.f32 %v1494_v2, %v583_v42  ;;  %910 = vst.msk [vmem:[%s1566_s9 + $0x88] sm:$0xff] %vm362_vm0, %v543_v39  ;;  %v565_v50 = vmul.f32 %v563_v33, %v1501_v5  ;;  %p1143_p3 = pnand %p1142_p11, %p1888_p7  ;;  %p1149_p4 = scmp.lt.s32.totalorder %s1147_s23, %s1141_s24 }
  0xb6   : > { %v545_v49 = vadd.f32 %v541_v29, %v535_v40  ;;  %v575_v51 = vmul.f32 %v1504_v6, %v573_v38  ;;  %v585_v52 = vmul.f32 %v1511_v8, %v583_v42  ;;  %v560_v54 = vadd.f32 %v915_v43, %v557_v32 }
  0xb7   : > { %911 = vst.msk [vmem:[%s1566_s9 + $0x90] sm:$0xff] %vm362_vm0, %v544_v44  ;;  %v578_v53 = vadd.f32 %v574_v41, %v568_v45  ;;  %v566_v55 = vmul.f32 %v563_v33, %v1514_v9  ;;  %v576_v56 = vmul.f32 %v1518_v15, %v573_v38  ;;  %v569_v57 = vadd.f32 %v565_v50, %v559_v47  ;;  %v937_v45 = vld [vmem:[%s1473_s6 + $0xe0] sm:$0xff]  ;;  %p1144_p8 = pneg %p1143_p3  ;;  %p1150_p10 = por %p1149_p4, %p1148_p13 }
  0xb8   : > { %912 = vst.msk [vmem:[%s1566_s9 + $0x98] sm:$0xff] %vm362_vm0, %v545_v49  ;;  %v586_v58 = vmul.f32 %v1521_v16, %v583_v42  ;;  %v561_v59 = vadd.f32 %v916_v48, %v557_v32  ;;  %v567_v60 = vmul.f32 %v563_v33, %v1529_v21  ;;  %v577_v3 = vmul.f32 %v1532_v22, %v573_v38  ;;  %v928_v32 = vld [vmem:[%s1473_s6 + $0xd8] sm:$0xff] }
  0xb9   : > { %v588_v62 = vadd.f32 %v584_v46, %v578_v53  ;;  %v570_v63 = vadd.f32 %v566_v55, %v560_v54  ;;  %v587_v4 = vmul.f32 %v1539_v28, %v583_v42  ;;  %v579_v7 = vadd.f32 %v575_v51, %v569_v57  ;;  %v938_v54 = vld [vmem:[%s1473_s6 + $0xe8] sm:$0xff]  ;;  %p1151_p2 = pnand %p1150_p10, %p1144_p8 }
  0xba   : > { %v571_v10 = vadd.f32 %v567_v60, %v561_v59  ;;  %v603_v11 = vstv %s1699_s7  ;;  %v609_v12 = vstv %s1701_s12  ;;  %v619_v19 = vstv %s1707_s30 }
  0xbb   : > { %921 = vst.msk [vmem:[%s1566_s9 + $0xa0] sm:$0xff] %vm362_vm0, %v588_v62  ;;  %v580_v14 = vadd.f32 %v576_v56, %v570_v63  ;;  %v604_v17 = vadd.f32 %v925_v61, %v603_v11  ;;  %v610_v18 = vmul.f32 %v609_v12, %v1488_v0  ;;  %v589_v20 = vadd.f32 %v585_v52, %v579_v7  ;;  %v939_v63 = vld [vmem:[%s1473_s6 + $0xf0] sm:$0xff] }
  0xbc   : > { %v581_v23 = vadd.f32 %v577_v3, %v571_v10  ;;  %v620_v24 = vmul.f32 %v1491_v1, %v619_v19  ;;  %v629_v25 = vstv %s1712_s8  ;;  %v605_v31 = vadd.f32 %v926_v13, %v603_v11 }
  0xbd   : > { %v590_v27 = vadd.f32 %v586_v58, %v580_v14  ;;  %v614_v29 = vadd.f32 %v610_v18, %v604_v17  ;;  %v630_v30 = vmul.f32 %v1494_v2, %v629_v25  ;;  %922 = vst.msk [vmem:[%s1566_s9 + $0xa8] sm:$0xff] %vm362_vm0, %v589_v20  ;;  %v611_v34 = vmul.f32 %v609_v12, %v1501_v5 }
  0xbe   : > { %v591_v33 = vadd.f32 %v587_v4, %v581_v23  ;;  %v621_v35 = vmul.f32 %v1504_v6, %v619_v19  ;;  %v631_v36 = vmul.f32 %v1511_v8, %v629_v25  ;;  %v606_v38 = vadd.f32 %v927_v26, %v603_v11 }
  0xbf   : > { %923 = vst.msk [vmem:[%s1566_s9 + $0xb0] sm:$0xff] %vm362_vm0, %v590_v27  ;;  %v624_v37 = vadd.f32 %v620_v24, %v614_v29  ;;  %v612_v39 = vmul.f32 %v609_v12, %v1514_v9  ;;  %v622_v40 = vmul.f32 %v1518_v15, %v619_v19  ;;  %v615_v41 = vadd.f32 %v611_v34, %v605_v31 }
  0xc0   : > { %924 = vst.msk [vmem:[%s1566_s9 + $0xb8] sm:$0xff] %vm362_vm0, %v591_v33  ;;  %v632_v42 = vmul.f32 %v1521_v16, %v629_v25  ;;  %v607_v43 = vadd.f32 %v928_v32, %v603_v11  ;;  %v613_v44 = vmul.f32 %v609_v12, %v1529_v21  ;;  %v623_v48 = vmul.f32 %v1532_v22, %v619_v19  ;;  %v940_v11 = vld [vmem:[%s1473_s6 + $0xf8] sm:$0xff]  ;;  %s955_s6 = sshll.u32 %s1227_s18, 12  ;;  %s690_s18 = scalar_lea.sflag [#allocation4], %s1459_s3 }
  0xc1   : > { %v634_v46 = vadd.f32 %v630_v30, %v624_v37  ;;  %v616_v47 = vadd.f32 %v612_v39, %v606_v38  ;;  %v633_v49 = vmul.f32 %v1539_v28, %v629_v25  ;;  %v625_v50 = vadd.f32 %v621_v35, %v615_v41  ;;  %s1802_s5 = scalar_lea.hbm %s1863_s4, %s955_s6 }
  0xc2   : > { %v617_v51 = vadd.f32 %v613_v44, %v607_v43  ;;  %v649_v52 = vstv %s1735_s14  ;;  %v655_v53 = vstv %s1737_s10  ;;  %v665_v58 = vstv %s1743_s0 }
  0xc3   : > { %933 = vst.msk [vmem:[%s1566_s9 + $0xc0] sm:$0xff] %vm362_vm0, %v634_v46  ;;  %v626_v55 = vadd.f32 %v622_v40, %v616_v47  ;;  %v650_v56 = vadd.f32 %v937_v45, %v649_v52  ;;  %v656_v57 = vmul.f32 %v655_v53, %v1488_v0  ;;  %v635_v59 = vadd.f32 %v631_v36, %v625_v50 }
  0xc4   : > { %v627_v60 = vadd.f32 %v623_v48, %v617_v51  ;;  %v666_v61 = vmul.f32 %v1491_v1, %v665_v58  ;;  %v675_v62 = vstv %s1748_s2  ;;  %v651_v10 = vadd.f32 %v938_v54, %v649_v52 }
  0xc5   : > { %v636_v3 = vadd.f32 %v632_v42, %v626_v55  ;;  %v660_v4 = vadd.f32 %v656_v57, %v650_v56  ;;  %v676_v7 = vmul.f32 %v1494_v2, %v675_v62  ;;  %934 = vst.msk [vmem:[%s1566_s9 + $0xc8] sm:$0xff] %vm362_vm0, %v635_v59  ;;  %v657_v0 = vmul.f32 %v655_v53, %v1501_v5 }
  0xc6   : > { %v637_v12 = vadd.f32 %v633_v49, %v627_v60  ;;  %v667_v13 = vmul.f32 %v1504_v6, %v665_v58  ;;  %v652_v1 = vadd.f32 %v939_v63, %v649_v52  ;;  %v658_v17 = vmul.f32 %v655_v53, %v1514_v9 }
  0xc7   : > { %935 = vst.msk [vmem:[%s1566_s9 + $0xd0] sm:$0xff] %vm362_vm0, %v636_v3  ;;  %v670_v14 = vadd.f32 %v666_v61, %v660_v4  ;;  %v668_v2 = vmul.f32 %v1518_v15, %v665_v58  ;;  %v661_v18 = vadd.f32 %v657_v0, %v651_v10  ;;  %v677_v19 = vmul.f32 %v1511_v8, %v675_v62 }
  0xc8   : > { %936 = vst.msk [vmem:[%s1566_s9 + $0xd8] sm:$0xff] %vm362_vm0, %v637_v12  ;;  %v653_v20 = vadd.f32 %v940_v11, %v649_v52  ;;  %v659_v5 = vmul.f32 %v655_v53, %v1529_v21  ;;  %v662_v23 = vadd.f32 %v658_v17, %v652_v1  ;;  %v678_v24 = vmul.f32 %v1521_v16, %v675_v62 }
  0xc9   : > { %v680_v6 = vadd.f32 %v676_v7, %v670_v14  ;;  %v669_v25 = vmul.f32 %v1532_v22, %v665_v58  ;;  %v671_v9 = vadd.f32 %v667_v13, %v661_v18  ;;  %v679_v26 = vmul.f32 %v1539_v28, %v675_v62 }
  0xca   : > { %v663_v15 = vadd.f32 %v659_v5, %v653_v20  ;;  %v672_v8 = vadd.f32 %v668_v2, %v662_v23 }
  0xcb   : > { %945 = vst.msk [vmem:[%s1566_s9 + $0xe0] sm:$0xff] %vm362_vm0, %v680_v6  ;;  %v681_v21 = vadd.f32 %v677_v19, %v671_v9 }
  0xcc   : > { %v673_v27 = vadd.f32 %v669_v25, %v663_v15  ;;  %v682_v29 = vadd.f32 %v678_v24, %v672_v8 }
  0xcd   : > { %946 = vst.msk [vmem:[%s1566_s9 + $0xe8] sm:$0xff] %vm362_vm0, %v681_v21 }
  0xce   : > { %v683_v16 = vadd.f32 %v679_v26, %v673_v27  ;;  %947 = vst.msk [vmem:[%s1566_s9 + $0xf0] sm:$0xff] %vm362_vm0, %v682_v29 }
  0xd0   : > { %948 = vst.msk [vmem:[%s1566_s9 + $0xf8] sm:$0xff] %vm362_vm0, %v683_v16 }
  0xd1   : > { %1154 = shalt.err (!%p1151_p2)
}
  0xd2   : > { %s1155_s9 = scalar_lea.hbm %s1802_s5, 4096  ;;  %s1159_s30 = scalar_lea.hbm %s1863_s4, 8192 }
  0xd3   : > { %p1156_p5 = scmp.ne.s32.totalorder %s1802_s5, %s1155_s9  ;;  %p1160_p12 = scmp.lt.u32.totalorder %s1802_s5, %s1863_s4 }
  0xd4   : > { %p1161_p0 = scmp.lt.u32.totalorder %s1159_s30, %s1155_s9  ;;  %p1163_p11 = scmp.lt.u32.totalorder %s1155_s9, %s1802_s5 }
  0xd5   : > { %p1157_p1 = pnand %p1156_p5, %p1888_p7 }
  0xd6   : > { %p1162_p9 = por %p1161_p0, %p1160_p12 }
  0xd7   : > { %p1158_p6 = pneg %p1157_p1 }
  0xd8   : > { %p1164_p3 = por %p1163_p11, %p1162_p9 }
  0xda   : > { %p1165_p8 = pnand %p1164_p3, %p1158_p6 }
  0xdc   : > { %1168 = shalt.err (!%p1165_p8)
}
  0xdd   : > { %s1244_s10 = smov 128   ;;  %s1245_s0 = smov 8  }
  0xde   : > { %971 = dma.vmem_to_hbm [thread:$0]  (%p1888_p7), %s1804_s25, 4096, %s1802_s5, %s690_s18, %s1244_s10, %s1244_s10, %s1245_s0  }
  0xdf PF: > { %s720_s2 = sand.u32 1, %s1215_s15   ;;  %p1889_p13 = scmp.ne.s32.totalorder %s1877_s28, 0 }
  0xe0   : > { %p1890_p4 = scmp.ge.s32.totalorder %s1235_s20, 2  ;;  %s721_s6 = scalar_lea.sflag [#allocation4], %s720_s2 }
  0xe2   : > { %p988_p10 = pnand %p1890_p4, %p1889_p13 }
  0xe4   : > { %1210 = dma.done.wait (!%p988_p10), %s721_s6, 4096  }
  0xe5   : > { %1212 = vsyncadd (!%p988_p10), %s721_s6, 4294963200  ;;  %s25_s20 = sadd.s32 1, %s1235_s20   ;;  %s1891_s15 = smov %s1219_s16 }
  0xe6   : > { %p22_p2 = scmp.ge.s32.totalorder %s25_s20, 4   ;;  %s1892_s16 = smov %s1223_s17 }
  0xe7   : > { %s1893_s17 = smov %s1385_s13  ;;  %s1894_s18 = smov %s1231_s19 }
  0xe8   : > { %s1895_s19 = smov %s1897_s22  ;;  %24 = sbr.rel (!%p22_p2) target bundleno = 14 (0xe), region = 119 }
  0xef   :  { %726 = vsyncpa [#allocation3], 1 }
  0xf0   :  { %728 = vsyncpa [#allocation3 + $0x1], 1 }
  0xf1   :  { %729 = vsyncpa [#allocation7], 1 }
  0xf2   :  { %731 = vsyncpa [#allocation7 + $0x1], 1 }
  0xf3   :  { %732 = vsyncpa [#allocation4], 1 }
  0xf4   :  { %734 = vsyncpa [#allocation4 + $0x1], 1 }
  0xf5   :  { %735 = vsyncpa [#allocation5], 1 }
  0xf6   :  { %737 = vsyncpa [#allocation5 + $0x1], 1 }
  0xf7   :  { %738 = vsyncpa [#allocation10], 1 }

</bundles_post_ra>
